<compile_context>
chip_gen: v6e
topology: v6e:2x2x1
jax: 0.10.0
libtpu: 0.0.40
codegen_flags: <defaults>
</compile_context>

<pallas_src>
import jax
import jax.numpy as jnp
from jax.experimental import pallas as pl
from jax.experimental.pallas import tpu as pltpu


def _round_up(a: int, b: int) -> int:
    return ((a + b - 1) // b) * b


def nonlinearf_kernel(x_ref, w1_ref, w2_ref, b2_ref, o_ref):
    # x_ref:  (TM, in_dim+1)   -- last column is ones (b1 folded into w1)
    # w1_ref: (in_dim+1, hidden)  resident
    # w2_ref: (hidden, out_pad)   resident, zero-padded to 128 lanes
    # b2_ref: (1, 1) SMEM scalar
    # o_ref:  (TM, out_pad)       lane-dense output block
    h = jnp.dot(x_ref[...], w1_ref[...], preferred_element_type=jnp.float32)
    # Sigmoid: exp and reciprocal both run on the EUP (free slot here).
    h = pl.reciprocal(1.0 + jnp.exp(-h), approx=True)
    # Second matmul against the 128-lane-padded W2 keeps the MXU pop and the
    # output store lane-aligned; padded lanes are sliced off in the wrapper.
    y = jnp.dot(h, w2_ref[...].astype(jnp.float32),
                preferred_element_type=jnp.float32)
    y = y + b2_ref[0, 0]                      # scalar bias splat from SMEM
    o_ref[...] = y.astype(o_ref.dtype)


def nonlinearf_forward(x, w1, b1, w2, b2, *, tm=None):
    """Fused two-layer MLP forward (Linear -> Sigmoid -> Linear)."""
    n, in_dim = x.shape
    hidden = w1.shape[1]
    out_dim = w2.shape[1]
    # SMEM-scalar bias path covers the NonLinearF default (out_dim=1). A wider head
    # would pass b2 as a lane-padded resident VMEM row instead.
    assert out_dim == 1, "this kernel specializes the module default out_dim=1"
    dtype = x.dtype

    # --- operand prep (wrapper-side layout plumbing) -------------------------------
    # Fold b1 into the first matmul: append a ones column to x, a bias row to W1.
    x_aug = jnp.concatenate([x, jnp.ones((n, 1), dtype)], axis=1)          # (n, in_dim+1)
    w1_aug = jnp.concatenate(
        [w1.astype(dtype), b1.reshape(1, hidden).astype(dtype)], axis=0)   # (in_dim+1, hidden)

    # Lane-dense output: pad out_dim up to a multiple of 128 lanes.
    out_pad = max(128, _round_up(out_dim, 128))
    w2_pad = jnp.pad(w2.astype(dtype), ((0, 0), (0, out_pad - out_dim)))   # (hidden, out_pad)
    b2_s = b2.reshape(1, 1).astype(jnp.float32)                            # SMEM scalar

    # --- tile / grid selection ------------------------------------------------------
    # Fat tiles amortize the ~0.35us per-step overhead; keep >= 2 grid steps when the
    # batch allows it so v7x's two TensorCores both get work. VMEM stays tiny
    # (< ~3 MiB double-buffered even at TM=1024), well under every generation's limit.
    if tm is None:
        tm = min(1024, _round_up(pl.cdiv(n, 2), 8))
    tm = max(8, min(tm, _round_up(n, 8)))
    n_pad = _round_up(n, tm)
    if n_pad != n:  # pad the batch instead of asserting divisibility
        x_aug = jnp.concatenate(
            [x_aug, jnp.zeros((n_pad - n, in_dim + 1), dtype)], axis=0)
    grid = (n_pad // tm,)

    out_padded = pl.pallas_call(
        nonlinearf_kernel,
        out_shape=jax.ShapeDtypeStruct((n_pad, out_pad), dtype),
        grid_spec=pltpu.PrefetchScalarGridSpec(
            num_scalar_prefetch=0,
            grid=grid,
            in_specs=[
                pl.BlockSpec((tm, in_dim + 1), lambda i: (i, 0)),      # streamed batch tile
                pl.BlockSpec((in_dim + 1, hidden), lambda i: (0, 0)),  # resident W1|b1
                pl.BlockSpec((hidden, out_pad), lambda i: (0, 0)),     # resident padded W2
                pl.BlockSpec(memory_space=pltpu.MemorySpace.SMEM),     # b2 scalar in SMEM
            ],
            out_specs=pl.BlockSpec((tm, out_pad), lambda i: (i, 0)),   # lane-dense store
        ),
        compiler_params=pltpu.CompilerParams(
            dimension_semantics=("parallel",)),
    )(x_aug, w1_aug, w2_pad, b2_s)

    # Drop the batch padding and the 127 padded output lanes.
    return out_padded[:n, :out_dim]


if __name__ == "__main__":
    # Small shapes consistent with NonLinearF(in_dim, baseinit, hidden=..., out_dim=1,
    # nonlin=True): in_dim=4, hidden=32, out_dim=1.
    N, IN_DIM, HIDDEN, OUT_DIM = 256, 4, 32, 1

    key = jax.random.PRNGKey(0)
    kx, kw1, kb1, kw2, kb2 = jax.random.split(key, 5)

    x = jax.random.normal(kx, (N, IN_DIM), dtype=jnp.float32)
    # Parameters stored transposed relative to torch's (out, in) convention.
    w1 = jax.random.normal(kw1, (IN_DIM, HIDDEN), dtype=jnp.float32) * 0.5
    b1 = jax.random.normal(kb1, (HIDDEN,), dtype=jnp.float32) * 0.1
    w2 = jax.random.normal(kw2, (HIDDEN, OUT_DIM), dtype=jnp.float32) * 0.5
    b2 = jax.random.normal(kb2, (OUT_DIM,), dtype=jnp.float32) * 0.1

    out = nonlinearf_forward(x, w1, b1, w2, b2)
    out = jax.block_until_ready(out)

    # Pure-JAX reference of the same forward pass (exact sigmoid). Tolerance allows
    # for the approximate EUP reciprocal used inside the kernel's sigmoid.
    ref = jax.nn.sigmoid(x @ w1 + b1) @ w2 + b2
    assert out.shape == (N, OUT_DIM)
    assert jnp.allclose(out, ref, atol=1e-2, rtol=1e-2)

    print("KERNEL_OK")
</pallas_src>

<mosaic_0001>
module attributes {stable_mosaic.version = 11 : i64} {
  func.func @nonlinearf_kernel(%arg0: i32, %arg1: memref<128x5xf32, #tpu.memory_space<vmem>>, %arg2: memref<5x32xf32, #tpu.memory_space<vmem>>, %arg3: memref<32x128xf32, #tpu.memory_space<vmem>>, %arg4: memref<1x1xf32, #tpu.memory_space<smem>>, %arg5: memref<128x128xf32, #tpu.memory_space<vmem>>) attributes {dimension_semantics = [#tpu.dimension_semantics<parallel>], iteration_bounds = array<i64: 2>, scalar_prefetch = 0 : i64, scratch_operands = 0 : i64, tpu.core_type = #tpu.core_type<tc>, window_params = [{transform_indices = @transform_0, window_bounds = array<i64: 128, 5>}, {pipeline_mode = #tpu.pipeline_mode<synchronous>, transform_indices = @transform_1, window_bounds = array<i64: 5, 32>}, {pipeline_mode = #tpu.pipeline_mode<synchronous>, transform_indices = @transform_2, window_bounds = array<i64: 32, 128>}, {transform_indices = @transform_3, window_bounds = array<i64: 1, 1>}, {transform_indices = @transform_4, window_bounds = array<i64: 128, 128>}]} {
    %c0 = arith.constant 0 : index
    %c0_0 = arith.constant 0 : index
    %0 = vector.load %arg1[%c0, %c0_0] : memref<128x5xf32, #tpu.memory_space<vmem>>, vector<128x5xf32>
    %c0_1 = arith.constant 0 : index
    %c0_2 = arith.constant 0 : index
    %1 = vector.load %arg2[%c0_1, %c0_2] : memref<5x32xf32, #tpu.memory_space<vmem>>, vector<5x32xf32>
    %cst = arith.constant dense<0.000000e+00> : vector<128x32xf32>
    %2 = tpu.matmul %0, %1, %cst {dimension_numbers = #tpu.dot_dimension_numbers<[1], [0], [0], [1], [0, 0, 1, 1], [], []>} : vector<128x5xf32>, vector<5x32xf32>, vector<128x32xf32> -> vector<128x32xf32>
    %cst_3 = arith.constant 0.000000e+00 : f32
    %3 = vector.broadcast %cst_3 : f32 to vector<128x32xf32>
    %4 = arith.subf %3, %2 : vector<128x32xf32>
    %5 = math.exp %4 : vector<128x32xf32>
    %cst_4 = arith.constant 1.000000e+00 : f32
    %6 = vector.broadcast %cst_4 : f32 to vector<128x32xf32>
    %7 = arith.addf %6, %5 : vector<128x32xf32>
    %8 = tpu.reciprocal %7 {approx = true} : vector<128x32xf32> -> vector<128x32xf32>
    %c0_5 = arith.constant 0 : index
    %c0_6 = arith.constant 0 : index
    %9 = vector.load %arg3[%c0_5, %c0_6] : memref<32x128xf32, #tpu.memory_space<vmem>>, vector<32x128xf32>
    %cst_7 = arith.constant dense<0.000000e+00> : vector<128x128xf32>
    %10 = tpu.matmul %8, %9, %cst_7 {dimension_numbers = #tpu.dot_dimension_numbers<[1], [0], [0], [1], [0, 0, 1, 1], [], []>} : vector<128x32xf32>, vector<32x128xf32>, vector<128x128xf32> -> vector<128x128xf32>
    %c0_8 = arith.constant 0 : index
    %c0_9 = arith.constant 0 : index
    %11 = memref.load %arg4[%c0_8, %c0_9] : memref<1x1xf32, #tpu.memory_space<smem>>
    %12 = vector.broadcast %11 : f32 to vector<128x128xf32>
    %13 = arith.addf %10, %12 : vector<128x128xf32>
    %c0_10 = arith.constant 0 : index
    %c0_11 = arith.constant 0 : index
    %14 = vector.load %arg5[%c0_10, %c0_11] : memref<128x128xf32, #tpu.memory_space<vmem>>, vector<128x128xf32>
    tpu.vector_store %arg5[%c0_10, %c0_11], %13 {strides = array<i32>} : memref<128x128xf32, #tpu.memory_space<vmem>>, vector<128x128xf32>,
    return
  }
  func.func @transform_0(%arg0: i32) -> (i32, i32) {
    %c0_i32 = arith.constant 0 : i32
    %c0_i32_0 = arith.constant 0 : i32
    return %arg0, %c0_i32 : i32, i32
  }
  func.func @transform_1(%arg0: i32) -> (i32, i32) {
    %c0_i32 = arith.constant 0 : i32
    %c0_i32_0 = arith.constant 0 : i32
    %c0_i32_1 = arith.constant 0 : i32
    return %c0_i32, %c0_i32_0 : i32, i32
  }
  func.func @transform_2(%arg0: i32) -> (i32, i32) {
    %c0_i32 = arith.constant 0 : i32
    %c0_i32_0 = arith.constant 0 : i32
    %c0_i32_1 = arith.constant 0 : i32
    return %c0_i32, %c0_i32_0 : i32, i32
  }
  func.func @transform_3(%arg0: i32) -> (i32, i32) {
    %c0_i32 = arith.constant 0 : i32
    %c0_i32_0 = arith.constant 0 : i32
    %c0_i32_1 = arith.constant 0 : i32
    return %c0_i32, %c0_i32_0 : i32, i32
  }
  func.func @transform_4(%arg0: i32) -> (i32, i32) {
    %c0_i32 = arith.constant 0 : i32
    %c0_i32_0 = arith.constant 0 : i32
    return %arg0, %c0_i32 : i32, i32
  }
}

</mosaic_0001>

<bundles_post_ra>
// kernel: tpu_custom_call.1
= control target key start
LH: loop header
LB: loop body
LE: loop exit
PB: predicated region body
PF: predicated region fallthrough
CT: control target
= control target key end

     0   :  { %s1315_s0 = inlined_call_operand.vmem [shape: f32[256,5], index: 0, kind: input, shape index: {}]   ;;  %s1316_s1 = inlined_call_operand.vmem [shape: f32[5,32], index: 1, kind: input, shape index: {}]   ;;  %s1317_s2 = inlined_call_operand.vmem [shape: f32[32,128], index: 2, kind: input, shape index: {}]   ;;  %s1318_s3 = inlined_call_operand.<no memory space> [shape: f32[1,1], index: 3, kind: input, shape index: {}]   ;;  %s1319_s4 = inlined_call_operand.hbm [shape: f32[256,128], index: 4, kind: output, shape index: {}]  }
   0x1   :  { %9 = sst [smem:[#allocation2]] %s1318_s3 }
   0x2   :  { %10 = vsyncpa [#allocation4], 0 }
   0x3   :  { %12 = vsyncpa [#allocation4 + $0x1], 0  ;;  %s1126_s17 = smov 0   ;;  %s1128_s18 = smov 0  }
   0x4   :  { %s1130_s19 = smov 0   ;;  %s1132_s20 = smov 0  }
   0x5 LB: > { %s1147_s3 = sadd.s32 4294967295, %s1093_s20   ;;  %s787_s21 = sadd.s32 4294967294, %s1093_s20   ;;  %s1093_s20 = sphi %s1132_s20, %s1325_s20   ;;  %s1089_s19 = sphi %s1130_s19, %s1324_s19   ;;  %s1085_s18 = sphi %s1128_s18, %s1323_s18   ;;  %s1081_s17 = sphi %s1126_s17, %s1322_s17  }
   0x6   : > { %s1151_s22 = sadd.s32 1, %s1093_s20   ;;  %s114_s23 = sadd.s32 1, %s1089_s19 }
   0x7   : > { %s111_s24 = ssub.s32 %s1093_s20, %s1151_s22  ;;  %p124_p0 = scmp.ne.s32.totalorder %s1089_s19, %s1085_s18 }
   0x8   : > { %p112_p1 = scmp.eq.s32.totalorder %s111_s24, 0  ;;  %p125_p2 = scmp.eq.s32.totalorder %s1147_s3, 1 }
   0x9   : > { %p130_p3 = scmp.ne.s32.totalorder %s1085_s18, %s1081_s17  ;;  %p131_p4 = scmp.eq.s32.totalorder %s787_s21, 1 }
   0xa   : > { %s1162_s25 = scalar_select %p112_p1, %s1089_s19, %s114_s23  }
   0xb   : > { %p1164_p5 = por %p125_p2, %p124_p0  ;;  %p1168_p6 = por %p131_p4, %p130_p3 }
   0xc   : > { %p790_p7 = scmp.ge.s32.totalorder %s1093_s20, 1  ;;  %p167_p8 = scmp.lt.s32.totalorder %s1093_s20, 3 }
   0xe   : > { %p168_p9 = pnand %p790_p7, %p167_p8 }
   0xf   : > { %s792_s30 = sshll.u32 (!%p168_p9), %s1147_s3, 4  ;;  %s499_s21 = sld [smem:[#allocation2]] (!%p168_p9) }
  0x10   : > { %171 = sbr.rel (%p168_p9) target bundleno = 496 (0x1f0), region = 36  ;;  %p194_p10 = scmp.lt.s32.totalorder (!%p168_p9), %s792_s30, 31 }
  0x11   : > { %s190_s23 = sand.u32 (!%p168_p9), 1, %s1085_s18   ;;  %s832_s29 = sshll.u32 (!%p168_p9), %s1147_s3, 11 }
  0x12   : > { %s791_s24 = sshll.u32 (!%p168_p9), %s190_s23, 7  ;;  %s1267_s7 = scalar_lea.hbm (!%p168_p9), %s1319_s4, %s832_s29 }
  0x13   : > { %s1246_s28 = scalar_lea.vmem (!%p168_p9), [#allocation3], %s791_s24  ;;  %s1275_s3 = scalar_lea.sflag (!%p168_p9), [#allocation4], %s190_s23 }
  0x14   : > { %s1095_s9 = smov (!%p168_p9), [#allocation3]  }
  0x15   : > { %v216_v0 = vld [vmem:[%s1316_s1] sm:$0x1f]  ;;  %vm266_vm0 = vcmask 1044480   ;;  %s1327_s30 = smov (!%p194_p10, %s792_s30), 31  ;;  %vm217_vm1 = vcmask 39936   ;;  %v498_v17 = vld [vmem:[%s1317_s2 + $0x18] sm:$0xff] }
  0x16   : > { %870 = vmatprep.subr.msk.mxu0 %vm266_vm0, %v216_v0  ;;  %s793_s5 = sshll.u32 %s1327_s30, 3  ;;  %896 = vmatprep.subr.mxu1 %v498_v17  ;;  %v497_v18 = vld [vmem:[%s1317_s2 + $0x10] sm:$0xff]  ;;  %v496_v19 = vld [vmem:[%s1317_s2 + $0x8] sm:$0xff]  ;;  %v495_v20 = vld [vmem:[%s1317_s2] sm:$0xff]  ;;  %vm501_vm2 = vcmask 261120   ;;  %s725_s30 = sshll.u32 %s1246_s28, 4  ;;  %s1269_s30 = int_to_ptr.vmem [resolvable:$true] %s725_s30 }
  0x17   : > { %871 = vmatpush3.msk.msra.mxu0 %vm266_vm0, %v216_v0  ;;  %s1181_s8 = scalar_lea.vmem %s1315_s0, %s793_s5  ;;  %897 = vmatpush3.msra.mxu1 %v498_v17  ;;  %s1037_s10 = sshll.u32 %s1095_s9, 4  ;;  %s1038_s10 = int_to_ptr.vmem [resolvable:$false] %s1037_s10 }
  0x18   : > { %v200_v1 = vld [vmem:[%s1181_s8] sm:$0xff]  ;;  %v201_v2 = vld [vmem:[%s1181_s8 + $0x8] sm:$0xff]  ;;  %v202_v3 = vld [vmem:[%s1181_s8 + $0x10] sm:$0xff]  ;;  %898 = vmatprep.subr.mxu1 %v497_v18  ;;  %s1039_s11 = scalar_lea.vmem %s1038_s10, 4096  ;;  %p1040_p0 = scmp.lt.s32.totalorder %s1269_s30, %s1038_s10 }
  0x19   : > { %872 = vmatprep.mubr.msk.f32.mxu0 %vm217_vm1, %v200_v1  ;;  %v203_v4 = vld [vmem:[%s1181_s8 + $0x18] sm:$0xff]  ;;  %v204_v5 = vld [vmem:[%s1181_s8 + $0x20] sm:$0xff]  ;;  %v205_v6 = vld [vmem:[%s1181_s8 + $0x28] sm:$0xff]  ;;  %899 = vmatpush3.msra.mxu1 %v497_v18 }
  0x1a   : > { %873 = vmatmul.mubr.msk.f32.vlgmr.msra.gmra.mxu0 %vm217_vm1, %v201_v2  ;;  %v206_v7 = vld [vmem:[%s1181_s8 + $0x30] sm:$0xff]  ;;  %v207_v8 = vld [vmem:[%s1181_s8 + $0x38] sm:$0xff]  ;;  %v208_v9 = vld [vmem:[%s1181_s8 + $0x40] sm:$0xff]  ;;  %900 = vmatprep.subr.mxu1 %v496_v19 }
  0x1b   : > { %875 = vmatprep.mubr.msk.f32.mxu0 %vm217_vm1, %v202_v3  ;;  %v209_v10 = vld [vmem:[%s1181_s8 + $0x48] sm:$0xff]  ;;  %v210_v11 = vld [vmem:[%s1181_s8 + $0x50] sm:$0xff]  ;;  %v211_v12 = vld [vmem:[%s1181_s8 + $0x58] sm:$0xff]  ;;  %901 = vmatpush3.msra.mxu1 %v496_v19 }
  0x1c   : > { %v212_v13 = vld [vmem:[%s1181_s8 + $0x60] sm:$0xff]  ;;  %v213_v14 = vld [vmem:[%s1181_s8 + $0x68] sm:$0xff]  ;;  %v214_v15 = vld [vmem:[%s1181_s8 + $0x70] sm:$0xff]  ;;  %902 = vmatprep.subr.mxu1 %v495_v20 }
  0x1d   : > { %v215_v16 = vld [vmem:[%s1181_s8 + $0x78] sm:$0xff]  ;;  %903 = vmatpush3.msra.mxu1 %v495_v20  ;;  %s1033_s8 = scalar_lea.vmem %s1269_s30, 2048 }
  0x1e   : > { %876 = vmatmul.mubr.msk.f32.gmra.mxu0 %vm217_vm1, %v203_v4  ;;  %p1034_p11 = scmp.ne.s32.totalorder %s1269_s30, %s1033_s8  ;;  %p1041_p1 = scmp.lt.s32.totalorder %s1039_s11, %s1033_s8 }
  0x1f   : > { %878 = vmatprep.mubr.msk.f32.mxu0 %vm217_vm1, %v204_v5 }
  0x20   : > { %p1035_p12 = pnand %p1034_p11, %p1164_p5  ;;  %p1042_p2 = por %p1041_p1, %p1040_p0 }
  0x22   : > { %879 = vmatmul.mubr.msk.f32.gmra.mxu0 %vm217_vm1, %v205_v6  ;;  %p1036_p13 = pneg %p1035_p12 }
  0x23   : > { %881 = vmatprep.mubr.msk.f32.mxu0 %vm217_vm1, %v206_v7 }
  0x24   : > { %p1043_p3 = pnand %p1042_p2, %p1036_p13 }
  0x26   : > { %882 = vmatmul.mubr.msk.f32.gmra.mxu0 %vm217_vm1, %v207_v8 }
  0x27   : > { %884 = vmatprep.mubr.msk.f32.mxu0 %vm217_vm1, %v208_v9 }
  0x2a   : > { %885 = vmatmul.mubr.msk.f32.gmra.mxu0 %vm217_vm1, %v209_v10 }
  0x2b   : > { %887 = vmatprep.mubr.msk.f32.mxu0 %vm217_vm1, %v210_v11 }
  0x2e   : > { %888 = vmatmul.mubr.msk.f32.gmra.mxu0 %vm217_vm1, %v211_v12 }
  0x2f   : > { %890 = vmatprep.mubr.msk.f32.mxu0 %vm217_vm1, %v212_v13 }
  0x32   : > { %891 = vmatmul.mubr.msk.f32.gmra.mxu0 %vm217_vm1, %v213_v14 }
  0x33   : > { %893 = vmatprep.mubr.msk.f32.mxu0 %vm217_vm1, %v214_v15 }
  0x36   : > { %894 = vmatmul.mubr.msk.f32.gmra.mxu0 %vm217_vm1, %v215_v16 }
  0xda   : > { %v874_v21 = vpop.f32.mrf.mxu0 }
  0xdb   : > { %v416_v22 = vsub.f32 0.0, %v874_v21 }
  0xdc   : > { %v336_v23 = vpop.f32.mrf.mxu0 }
  0xdd   : > { %v433_v24 = vmul.f32 1.442695, %v416_v22  ;;  %v415_v25 = vsub.f32 0.0, %v336_v23 }
  0xde   : > { %v877_v26 = vpop.f32.mrf.mxu0 }
  0xdf   : > { %969 = vpow2.f32 %v433_v24  ;;  %v431_v27 = vmul.f32 1.442695, %v415_v25  ;;  %v418_v28 = vsub.f32 0.0, %v877_v26 }
  0xe0   : > { %v346_v29 = vpop.f32.mrf.mxu0 }
  0xe1   : > { %971 = vpow2.f32 %v431_v27  ;;  %v437_v30 = vmul.f32 1.442695, %v418_v28  ;;  %v417_v31 = vsub.f32 0.0, %v346_v29 }
  0xe2   : > { %v880_v32 = vpop.f32.mrf.mxu0 }
  0xe3   : > { %973 = vpow2.f32 %v437_v30  ;;  %v435_v33 = vmul.f32 1.442695, %v417_v31  ;;  %v420_v34 = vsub.f32 0.0, %v880_v32 }
  0xe4   : > { %v356_v35 = vpop.f32.mrf.mxu0 }
  0xe5   : > { %975 = vpow2.f32 %v435_v33  ;;  %v441_v36 = vmul.f32 1.442695, %v420_v34  ;;  %v419_v37 = vsub.f32 0.0, %v356_v35 }
  0xe6   : > { %v883_v38 = vpop.f32.mrf.mxu0 }
  0xe7   : > { %977 = vpow2.f32 %v441_v36  ;;  %v439_v39 = vmul.f32 1.442695, %v419_v37  ;;  %v422_v40 = vsub.f32 0.0, %v883_v38 }
  0xe8   : > { %v366_v41 = vpop.f32.mrf.mxu0 }
  0xe9   : > { %979 = vpow2.f32 %v439_v39  ;;  %v445_v42 = vmul.f32 1.442695, %v422_v40  ;;  %v421_v43 = vsub.f32 0.0, %v366_v41 }
  0xea   : > { %v886_v44 = vpop.f32.mrf.mxu0 }
  0xeb   : > { %981 = vpow2.f32 %v445_v42  ;;  %v443_v45 = vmul.f32 1.442695, %v421_v43  ;;  %v424_v46 = vsub.f32 0.0, %v886_v44 }
  0xec   : > { %v970_v47 = vpop.eup %969  ;;  %v376_v48 = vpop.f32.mrf.mxu0 }
  0xed   : > { %v464_v49 = vadd.f32 1.0, %v970_v47  ;;  %983 = vpow2.f32 %v443_v45  ;;  %v449_v50 = vmul.f32 1.442695, %v424_v46  ;;  %v423_v51 = vsub.f32 0.0, %v376_v48 }
  0xee   : > { %v972_v52 = vpop.eup %971  ;;  %v889_v53 = vpop.f32.mrf.mxu0 }
  0xef   : > { %985 = vrcp.f32 %v464_v49  ;;  %v463_v54 = vadd.f32 1.0, %v972_v52  ;;  %v447_v55 = vmul.f32 1.442695, %v423_v51  ;;  %v426_v56 = vsub.f32 0.0, %v889_v53 }
  0xf0   : > { %v974_v57 = vpop.eup %973  ;;  %987 = vpow2.f32 %v449_v50  ;;  %v386_v58 = vpop.f32.mrf.mxu0  ;;  %v500_v53 = vstv %s499_s21 }
  0xf1   : > { %989 = vrcp.f32 %v463_v54  ;;  %v466_v59 = vadd.f32 1.0, %v974_v57  ;;  %v453_v60 = vmul.f32 1.442695, %v426_v56  ;;  %v425_v61 = vsub.f32 0.0, %v386_v58 }
  0xf2   : > { %v976_v62 = vpop.eup %975  ;;  %991 = vpow2.f32 %v447_v55  ;;  %v892_v63 = vpop.f32.mrf.mxu0 }
  0xf3   : > { %993 = vrcp.f32 %v466_v59  ;;  %v465_v0 = vadd.f32 1.0, %v976_v62  ;;  %v451_v1 = vmul.f32 1.442695, %v425_v61  ;;  %v428_v2 = vsub.f32 0.0, %v892_v63 }
  0xf4   : > { %v978_v3 = vpop.eup %977  ;;  %995 = vpow2.f32 %v453_v60  ;;  %v396_v4 = vpop.f32.mrf.mxu0 }
  0xf5   : > { %997 = vrcp.f32 %v465_v0  ;;  %v468_v5 = vadd.f32 1.0, %v978_v3  ;;  %v457_v6 = vmul.f32 1.442695, %v428_v2  ;;  %v427_v7 = vsub.f32 0.0, %v396_v4 }
  0xf6   : > { %v980_v8 = vpop.eup %979  ;;  %999 = vpow2.f32 %v451_v1  ;;  %v895_v9 = vpop.f32.mrf.mxu0 }
  0xf7   : > { %1001 = vrcp.f32 %v468_v5  ;;  %v467_v10 = vadd.f32 1.0, %v980_v8  ;;  %v455_v11 = vmul.f32 1.442695, %v427_v7  ;;  %v430_v12 = vsub.f32 0.0, %v895_v9 }
  0xf8   : > { %v982_v13 = vpop.eup %981  ;;  %1003 = vpow2.f32 %v457_v6  ;;  %v406_v14 = vpop.f32.mrf.mxu0 }
  0xf9   : > { %1005 = vrcp.f32 %v467_v10  ;;  %v470_v15 = vadd.f32 1.0, %v982_v13  ;;  %v461_v16 = vmul.f32 1.442695, %v430_v12  ;;  %v429_v17 = vsub.f32 0.0, %v406_v14 }
  0xfa   : > { %v984_v18 = vpop.eup %983  ;;  %1007 = vpow2.f32 %v455_v11 }
  0xfb   : > { %1009 = vrcp.f32 %v470_v15  ;;  %v469_v19 = vadd.f32 1.0, %v984_v18  ;;  %v459_v20 = vmul.f32 1.442695, %v429_v17 }
  0xfc   : > { %v986_v21 = vpop.eup %985  ;;  %1011 = vpow2.f32 %v461_v16 }
  0xfd   : > { %v988_v22 = vpop.eup %987  ;;  %1013 = vrcp.f32 %v469_v19 }
  0xfe   : > { %v990_v23 = vpop.eup %989  ;;  %1015 = vpow2.f32 %v459_v20  ;;  %v472_v25 = vadd.f32 1.0, %v988_v22 }
  0xff   : > { %v992_v24 = vpop.eup %991  ;;  %904 = vmatprep.mubr.msk.f32.mxu1 %vm501_vm2, %v990_v23 }
 0x100   : > { %v994_v26 = vpop.eup %993  ;;  %v471_v27 = vadd.f32 1.0, %v992_v24  ;;  %905 = vmatmul.mubr.msk.f32.vlgmr.msra.gmra.mxu1 %vm501_vm2, %v986_v21 }
 0x101   : > { %v996_v28 = vpop.eup %995 }
 0x102   : > { %v998_v29 = vpop.eup %997  ;;  %1017 = vrcp.f32 %v471_v27  ;;  %v474_v31 = vadd.f32 1.0, %v996_v28 }
 0x103   : > { %v1000_v30 = vpop.eup %999  ;;  %1019 = vrcp.f32 %v472_v25  ;;  %907 = vmatprep.mubr.msk.f32.mxu1 %vm501_vm2, %v998_v29 }
 0x104   : > { %v1002_v32 = vpop.eup %1001  ;;  %v473_v33 = vadd.f32 1.0, %v1000_v30  ;;  %908 = vmatmul.mubr.msk.f32.gmra.mxu1 %vm501_vm2, %v994_v26 }
 0x105   : > { %v1004_v34 = vpop.eup %1003 }
 0x106   : > { %v1006_v35 = vpop.eup %1005  ;;  %1021 = vrcp.f32 %v473_v33  ;;  %v476_v37 = vadd.f32 1.0, %v1004_v34 }
 0x107   : > { %v1008_v36 = vpop.eup %1007  ;;  %1023 = vrcp.f32 %v474_v31  ;;  %910 = vmatprep.mubr.msk.f32.mxu1 %vm501_vm2, %v1006_v35 }
 0x108   : > { %v1010_v38 = vpop.eup %1009  ;;  %v475_v39 = vadd.f32 1.0, %v1008_v36  ;;  %911 = vmatmul.mubr.msk.f32.gmra.mxu1 %vm501_vm2, %v1002_v32 }
 0x109   : > { %v1012_v40 = vpop.eup %1011 }
 0x10a   : > { %v1014_v41 = vpop.eup %1013  ;;  %1025 = vrcp.f32 %v475_v39  ;;  %v478_v43 = vadd.f32 1.0, %v1012_v40 }
 0x10b   : > { %v1016_v42 = vpop.eup %1015  ;;  %1027 = vrcp.f32 %v476_v37  ;;  %913 = vmatprep.mubr.msk.f32.mxu1 %vm501_vm2, %v1014_v41 }
 0x10c   : > { %v477_v44 = vadd.f32 1.0, %v1016_v42  ;;  %914 = vmatmul.mubr.msk.f32.gmra.mxu1 %vm501_vm2, %v1010_v38 }
 0x10e   : > { %1029 = vrcp.f32 %v477_v44 }
 0x10f   : > { %v1018_v45 = vpop.eup %1017  ;;  %1031 = vrcp.f32 %v478_v43 }
 0x110   : > { %v1020_v46 = vpop.eup %1019  ;;  %916 = vmatprep.mubr.msk.f32.mxu1 %vm501_vm2, %v1018_v45 }
 0x111   : > { %917 = vmatmul.mubr.msk.f32.gmra.mxu1 %vm501_vm2, %v1020_v46 }
 0x113   : > { %v1022_v47 = vpop.eup %1021 }
 0x114   : > { %v1024_v48 = vpop.eup %1023  ;;  %919 = vmatprep.mubr.msk.f32.mxu1 %vm501_vm2, %v1022_v47 }
 0x115   : > { %920 = vmatmul.mubr.msk.f32.gmra.mxu1 %vm501_vm2, %v1024_v48 }
 0x117   : > { %v1026_v49 = vpop.eup %1025 }
 0x118   : > { %v1028_v50 = vpop.eup %1027  ;;  %922 = vmatprep.mubr.msk.f32.mxu1 %vm501_vm2, %v1026_v49 }
 0x119   : > { %923 = vmatmul.mubr.msk.f32.gmra.mxu1 %vm501_vm2, %v1028_v50 }
 0x11b   : > { %v1030_v51 = vpop.eup %1029 }
 0x11c   : > { %v1032_v52 = vpop.eup %1031  ;;  %925 = vmatprep.mubr.msk.f32.mxu1 %vm501_vm2, %v1030_v51 }
 0x11d   : > { %926 = vmatmul.mubr.msk.f32.gmra.mxu1 %vm501_vm2, %v1032_v52 }
 0x1c0   : > { %v906_v54 = vpop.f32.mrf.mxu1 }
 0x1c1   : > { %v622_v55 = vadd.f32 %v906_v54, %v500_v53 }
 0x1c2   : > { %v616_v56 = vpop.f32.mrf.mxu1 }
 0x1c3   : > { %696 = vst [vmem:[%s1246_s28 + $0x8] sm:$0xff] %v622_v55  ;;  %v617_v57 = vadd.f32 %v616_v56, %v500_v53 }
 0x1c4   : > { %v909_v58 = vpop.f32.mrf.mxu1 }
 0x1c5   : > { %695 = vst [vmem:[%s1246_s28] sm:$0xff] %v617_v57  ;;  %v632_v59 = vadd.f32 %v909_v58, %v500_v53 }
 0x1c6   : > { %v626_v60 = vpop.f32.mrf.mxu1 }
 0x1c7   : > { %698 = vst [vmem:[%s1246_s28 + $0x18] sm:$0xff] %v632_v59  ;;  %v627_v61 = vadd.f32 %v626_v60, %v500_v53 }
 0x1c8   : > { %v912_v62 = vpop.f32.mrf.mxu1 }
 0x1c9   : > { %697 = vst [vmem:[%s1246_s28 + $0x10] sm:$0xff] %v627_v61  ;;  %v642_v63 = vadd.f32 %v912_v62, %v500_v53 }
 0x1ca   : > { %v636_v0 = vpop.f32.mrf.mxu1 }
 0x1cb   : > { %700 = vst [vmem:[%s1246_s28 + $0x28] sm:$0xff] %v642_v63  ;;  %v637_v1 = vadd.f32 %v636_v0, %v500_v53 }
 0x1cc   : > { %v915_v2 = vpop.f32.mrf.mxu1 }
 0x1cd   : > { %699 = vst [vmem:[%s1246_s28 + $0x20] sm:$0xff] %v637_v1  ;;  %v652_v3 = vadd.f32 %v915_v2, %v500_v53 }
 0x1ce   : > { %v646_v4 = vpop.f32.mrf.mxu1 }
 0x1cf   : > { %702 = vst [vmem:[%s1246_s28 + $0x38] sm:$0xff] %v652_v3  ;;  %v647_v5 = vadd.f32 %v646_v4, %v500_v53 }
 0x1d1   : > { %701 = vst [vmem:[%s1246_s28 + $0x30] sm:$0xff] %v647_v5  ;;  %v918_v6 = vpop.f32.mrf.mxu1 }
 0x1d2   : > { %v662_v7 = vadd.f32 %v918_v6, %v500_v53 }
 0x1d3   : > { %v656_v8 = vpop.f32.mrf.mxu1 }
 0x1d4   : > { %704 = vst [vmem:[%s1246_s28 + $0x48] sm:$0xff] %v662_v7  ;;  %v657_v9 = vadd.f32 %v656_v8, %v500_v53 }
 0x1d5   : > { %v921_v10 = vpop.f32.mrf.mxu1 }
 0x1d6   : > { %703 = vst [vmem:[%s1246_s28 + $0x40] sm:$0xff] %v657_v9  ;;  %v672_v11 = vadd.f32 %v921_v10, %v500_v53 }
 0x1d7   : > { %v666_v12 = vpop.f32.mrf.mxu1 }
 0x1d8   : > { %706 = vst [vmem:[%s1246_s28 + $0x58] sm:$0xff] %v672_v11  ;;  %v667_v13 = vadd.f32 %v666_v12, %v500_v53 }
 0x1d9   : > { %v924_v14 = vpop.f32.mrf.mxu1 }
 0x1da   : > { %705 = vst [vmem:[%s1246_s28 + $0x50] sm:$0xff] %v667_v13  ;;  %v682_v15 = vadd.f32 %v924_v14, %v500_v53 }
 0x1db   : > { %v676_v16 = vpop.f32.mrf.mxu1 }
 0x1dc   : > { %708 = vst [vmem:[%s1246_s28 + $0x68] sm:$0xff] %v682_v15  ;;  %v677_v17 = vadd.f32 %v676_v16, %v500_v53 }
 0x1dd   : > { %v927_v18 = vpop.f32.mrf.mxu1 }
 0x1de   : > { %707 = vst [vmem:[%s1246_s28 + $0x60] sm:$0xff] %v677_v17  ;;  %v692_v19 = vadd.f32 %v927_v18, %v500_v53 }
 0x1df   : > { %v686_v20 = vpop.f32.mrf.mxu1 }
 0x1e0   : > { %710 = vst [vmem:[%s1246_s28 + $0x78] sm:$0xff] %v692_v19  ;;  %v687_v21 = vadd.f32 %v686_v20, %v500_v53 }
 0x1e2   : > { %709 = vst [vmem:[%s1246_s28 + $0x70] sm:$0xff] %v687_v21 }
 0x1e3   : > { %1046 = shalt.err (!%p1043_p3)
}
 0x1e4   : > { %s1047_s12 = scalar_lea.hbm %s1267_s7, 2048  ;;  %s1051_s15 = scalar_lea.hbm %s1319_s4, 4096 }
 0x1e5   : > { %p1048_p4 = scmp.ne.s32.totalorder %s1267_s7, %s1047_s12  ;;  %p1052_p9 = scmp.lt.s32.totalorder %s1267_s7, %s1319_s4 }
 0x1e6   : > { %p1053_p10 = scmp.lt.s32.totalorder %s1051_s15, %s1047_s12 }
 0x1e7   : > { %p1049_p7 = pnand %p1048_p4, %p1164_p5 }
 0x1e8   : > { %p1054_p11 = por %p1053_p10, %p1052_p9 }
 0x1e9   : > { %p1050_p8 = pneg %p1049_p7 }
 0x1eb   : > { %p1055_p12 = pnand %p1054_p11, %p1050_p8 }
 0x1ed   : > { %1058 = shalt.err (!%p1055_p12)
}
 0x1ee   : > { %s1096_s23 = smov 128   ;;  %s1097_s24 = smov 8  }
 0x1ef   : > { %928 = dma.vmem_to_hbm [thread:$0]  (%p1164_p5), %s1269_s30, 2048, %s1267_s7, %s1275_s3, %s1096_s23, %s1096_s23, %s1097_s24  }
 0x1f0 PF: > { %p934_p13 = scmp.ge.s32.totalorder %s1093_s20, 2  ;;  %s740_s28 = sand.u32 1, %s1081_s17  }
 0x1f1   : > { %s741_s29 = scalar_lea.sflag [#allocation4], %s740_s28 }
 0x1f2   : > { %p931_p0 = pnand %p934_p13, %p1168_p6 }
 0x1f4   : > { %p932_p1 = pneg %p931_p0 }
 0x1f6   : > { %1076 = dma.done.wait (%p932_p1), %s741_s29, 2048  }
 0x1f7   : > { %1078 = vsyncadd (%p932_p1), %s741_s29, 4294965248  ;;  %p15_p2 = scmp.ge.s32.totalorder %s1151_s22, 4   ;;  %s1322_s17 = smov %s1085_s18 }
 0x1f8   : > { %s1323_s18 = smov %s1089_s19  ;;  %s1324_s19 = smov %s1162_s25 }
 0x1f9   : > { %s1325_s20 = smov %s1151_s22  ;;  %17 = sbr.rel (!%p15_p2) target bundleno = 5 (0x5), region = 71 }
 0x1fe   :  { %746 = vsyncpa [#allocation4], 1 }
 0x1ff   :  { %748 = vsyncpa [#allocation4 + $0x1], 1 }

</bundles_post_ra>
